<compile_context>
chip_gen: v5e
topology: v5e:2x2
jax: 0.10.0
libtpu: 0.0.40
codegen_flags: <defaults>
</compile_context>

<pallas_src>
import functools
import math

import jax
import jax.numpy as jnp
from jax.experimental import pallas as pl
from jax.experimental.pallas import tpu as pltpu


def _vmem_limit_bytes():
    """Generation-aware scoped-VMEM budget (v5e/v6e: 128 MiB phys, v7x: 64 MiB)."""
    try:
        cap = int(pltpu.get_tpu_info().vmem_capacity_bytes)
    except Exception:
        return 32 * 1024 * 1024          # conservative, known-good fallback
    return max(32 * 1024 * 1024, min(96 * 1024 * 1024, cap - 24 * 1024 * 1024))


_VMEM_LIMIT = _vmem_limit_bytes()


def _pick_tile(dim, pref, mult):
    """Largest tile <= pref that divides dim and is a multiple of `mult`;
    falls back to the full dim (block == full array dim is always legal)."""
    if dim <= pref:
        return dim
    t = (pref // mult) * mult
    while t >= mult:
        if dim % t == 0:
            return t
        t -= mult
    return dim


# ----------------------------- tiled matmul ---------------------------------

def _matmul_kernel(a_ref, b_ref, o_ref, acc_ref):
    @pl.when(pl.program_id(2) == 0)
    def _init():
        acc_ref[...] = jnp.zeros_like(acc_ref)

    acc_ref[...] += jnp.dot(a_ref[...], b_ref[...],
                            preferred_element_type=jnp.float32)

    @pl.when(pl.program_id(2) == pl.num_programs(2) - 1)
    def _done():
        o_ref[...] = acc_ref[...].astype(o_ref.dtype)


def pallas_matmul(a, b, *, tm=512, tn=256, tk=512, out_dtype=None):
    M, K = a.shape
    K2, N = b.shape
    assert K == K2
    out_dtype = out_dtype or a.dtype
    tm = _pick_tile(M, tm, 16)       # bf16 sublane packing
    tn = _pick_tile(N, tn, 128)
    tk = _pick_tile(K, tk, 128)
    return pl.pallas_call(
        _matmul_kernel,
        out_shape=jax.ShapeDtypeStruct((M, N), out_dtype),
        grid=(M // tm, N // tn, K // tk),
        in_specs=[pl.BlockSpec((tm, tk), lambda i, j, k: (i, k)),
                  pl.BlockSpec((tk, tn), lambda i, j, k: (k, j))],
        out_specs=pl.BlockSpec((tm, tn), lambda i, j, k: (i, j)),
        scratch_shapes=[pltpu.VMEM((tm, tn), jnp.float32)],
        compiler_params=pltpu.CompilerParams(
            dimension_semantics=("parallel", "parallel", "arbitrary"),
            vmem_limit_bytes=_VMEM_LIMIT),
    )(a, b)


# ------------------------ RMSNorm fused into matmul --------------------------

def _rmsnorm_matmul_kernel(x_ref, g_ref, w_ref, o_ref, xn_sc, *, eps):
    # normalize the row tile once (j == 0) and reuse it for every column tile
    @pl.when(pl.program_id(1) == 0)
    def _norm():
        x = x_ref[...].astype(jnp.float32)
        r = jax.lax.rsqrt(jnp.mean(x * x, axis=-1, keepdims=True) + eps)
        xn_sc[...] = (x * r).astype(x_ref.dtype) * g_ref[...]   # torch RMSNorm

    o_ref[...] = jnp.dot(xn_sc[...], w_ref[...],
                         preferred_element_type=jnp.float32).astype(o_ref.dtype)


def pallas_rmsnorm_matmul(x, g, w, eps, *, tm=256, tn=512):
    M, D = x.shape
    _, N = w.shape
    tm = _pick_tile(M, tm, 16)
    tn = _pick_tile(N, tn, 128)
    return pl.pallas_call(
        functools.partial(_rmsnorm_matmul_kernel, eps=eps),
        out_shape=jax.ShapeDtypeStruct((M, N), x.dtype),
        grid=(M // tm, N // tn),
        in_specs=[pl.BlockSpec((tm, D), lambda i, j: (i, 0)),
                  pl.BlockSpec((1, D), lambda i, j: (0, 0)),
                  pl.BlockSpec((D, tn), lambda i, j: (0, j))],
        out_specs=pl.BlockSpec((tm, tn), lambda i, j: (i, j)),
        scratch_shapes=[pltpu.VMEM((tm, D), x.dtype)],
        compiler_params=pltpu.CompilerParams(
            # j carries the cached-norm scratch -> must stay on one core, in order
            dimension_semantics=("parallel", "arbitrary"),
            vmem_limit_bytes=_VMEM_LIMIT),
    )(x, g.reshape(1, D), w)


# ------------------------ RMSNorm + SwiGLU fused ------------------------------

def _rmsnorm_swiglu_kernel(x_ref, g_ref, w1_ref, w3_ref, o_ref, xn_sc, *, eps):
    @pl.when(pl.program_id(1) == 0)
    def _norm():
        x = x_ref[...].astype(jnp.float32)
        r = jax.lax.rsqrt(jnp.mean(x * x, axis=-1, keepdims=True) + eps)
        xn_sc[...] = (x * r).astype(x_ref.dtype) * g_ref[...]

    xn = xn_sc[...]
    h1 = jnp.dot(xn, w1_ref[...], preferred_element_type=jnp.float32)
    h3 = jnp.dot(xn, w3_ref[...], preferred_element_type=jnp.float32)
    o_ref[...] = (h1 * jax.nn.sigmoid(h1) * h3).astype(o_ref.dtype)


def pallas_rmsnorm_swiglu(x, g, w1, w3, eps, *, tm=256, tn=512):
    M, D = x.shape
    _, H = w1.shape
    tm = _pick_tile(M, tm, 16)
    tn = _pick_tile(H, tn, 128)
    return pl.pallas_call(
        functools.partial(_rmsnorm_swiglu_kernel, eps=eps),
        out_shape=jax.ShapeDtypeStruct((M, H), x.dtype),
        grid=(M // tm, H // tn),
        in_specs=[pl.BlockSpec((tm, D), lambda i, j: (i, 0)),
                  pl.BlockSpec((1, D), lambda i, j: (0, 0)),
                  pl.BlockSpec((D, tn), lambda i, j: (0, j)),
                  pl.BlockSpec((D, tn), lambda i, j: (0, j))],
        out_specs=pl.BlockSpec((tm, tn), lambda i, j: (i, j)),
        scratch_shapes=[pltpu.VMEM((tm, D), x.dtype)],
        compiler_params=pltpu.CompilerParams(
            dimension_semantics=("parallel", "arbitrary"),
            vmem_limit_bytes=_VMEM_LIMIT),
    )(x, g.reshape(1, D), w1, w3)


# --------------- kv-tiled flash attention w/ fused RoPE + adapter -------------

def _flash_attn_kernel(q_ref, k_ref, v_ref, cq_ref, sq_ref, ck_ref, sk_ref,
                       akv_ref, gate_ref, o_ref,
                       q_sc, m_sc, l_sc, acc_sc, *,
                       n_heads, n_kv_heads, n_rep, head_dim, sm_scale,
                       block_q, block_kv):
    qi = pl.program_id(1)
    ki = pl.program_id(2)
    nk = pl.num_programs(2)
    hd2 = head_dim // 2
    nkv = n_kv_heads * head_dim

    @pl.when(ki == 0)
    def _init():
        # RoPE (half-split; matches torch's interleaved form via the weight
        # column permutation done at init) + sm_scale, fused into the q tile
        # once per q tile, laid out per KV group into the VMEM scratch.
        cq = cq_ref[...]
        sq = sq_ref[...]
        for h in range(n_heads):
            qh = q_ref[0, :, h * head_dim:(h + 1) * head_dim].astype(jnp.float32)
            qh = (qh * cq + pltpu.roll(qh, shift=hd2, axis=1) * sq) * sm_scale
            g, r = divmod(h, n_rep)
            q_sc[g, r * block_q:(r + 1) * block_q, :] = qh.astype(q_sc.dtype)
        m_sc[...] = jnp.full_like(m_sc, -jnp.inf)
        l_sc[...] = jnp.zeros_like(l_sc)
        acc_sc[...] = jnp.zeros_like(acc_sc)

    # --- causal text segment: online softmax, skip fully-masked kv tiles ---
    @pl.when(ki * block_kv <= qi * block_q + block_q - 1)
    def _update():
        ck = ck_ref[...]
        sk = sk_ref[...]
        rows = jax.lax.broadcasted_iota(
            jnp.int32, (n_rep * block_q, block_kv), 0)
        q_pos = qi * block_q + rows % block_q
        k_pos = ki * block_kv + jax.lax.broadcasted_iota(
            jnp.int32, (n_rep * block_q, block_kv), 1)
        neg = jnp.where(k_pos > q_pos, -jnp.inf, 0.0).astype(jnp.float32)

        for g in range(n_kv_heads):                      # GQA: one 2-D matmul / group
            kg = k_ref[0, :, g * head_dim:(g + 1) * head_dim].astype(jnp.float32)
            kg = (kg * ck + pltpu.roll(kg, shift=hd2, axis=1) * sk).astype(q_sc.dtype)
            vg = v_ref[0, :, g * head_dim:(g + 1) * head_dim]

            s = jnp.einsum('qd,kd->qk', q_sc[g], kg,
                           preferred_element_type=jnp.float32) + neg
            m_prev = m_sc[g]
            m_new = jnp.maximum(m_prev, s.max(axis=-1, keepdims=True))
            alpha = jnp.exp(m_prev - m_new)
            p = jnp.exp(s - m_new)
            l_sc[g] = alpha * l_sc[g] + p.sum(axis=-1, keepdims=True)
            acc_sc[g] = alpha * acc_sc[g] + jnp.dot(
                p.astype(vg.dtype), vg, preferred_element_type=jnp.float32)
            m_sc[g] = m_new

    # --- finalize: normalize text part, add tanh-gated adapter segment ------
    @pl.when(ki == nk - 1)
    def _done():
        for g in range(n_kv_heads):
            out_g = acc_sc[g] / l_sc[g]                  # exact normalization
            ka = akv_ref[:, g * head_dim:(g + 1) * head_dim]          # (A, Dh)
            va = akv_ref[:, nkv + g * head_dim:nkv + (g + 1) * head_dim]
            sa = jnp.einsum('qd,kd->qk', q_sc[g], ka,
                            preferred_element_type=jnp.float32)
            pa = jnp.exp(sa - sa.max(axis=-1, keepdims=True))
            pa = pa / pa.sum(axis=-1, keepdims=True)
            oa = jnp.dot(pa.astype(va.dtype), va,
                         preferred_element_type=jnp.float32)
            for r in range(n_rep):
                h = g * n_rep + r
                rr = slice(r * block_q, (r + 1) * block_q)
                o_ref[0, :, h * head_dim:(h + 1) * head_dim] = (
                    out_g[rr] + gate_ref[h] * oa[rr]).astype(o_ref.dtype)


def pallas_flash_attention(qkv, cos, sin, akv, gate_tanh, *, n_heads,
                           n_kv_heads, head_dim, sm_scale,
                           block_q=256, block_kv=256):
    """qkv: (B, S, H*Dh + 2*KVH*Dh) fused projection activation.
    Returns attention output in (B, S, H*Dh)."""
    B, S, C = qkv.shape
    nq = n_heads * head_dim
    nkv = n_kv_heads * head_dim
    n_rep = n_heads // n_kv_heads
    A = akv.shape[0]
    bq = _pick_tile(S, block_q, 16)
    bkv = _pick_tile(S, block_kv, 128)     # lane-dense score tiles

    # clamp fully-masked (future) kv tiles onto an already-resident block so
    # their HBM DMA is skipped (~half the K/V traffic for causal attention).
    def _last_kv(i):
        return ((i + 1) * bq - 1) // bkv

    k_map = lambda b, i, j: (b, jnp.minimum(j, _last_kv(i)), n_rep)
    v_map = lambda b, i, j: (b, jnp.minimum(j, _last_kv(i)), n_rep + 1)
    ck_map = lambda b, i, j: (jnp.minimum(j, _last_kv(i)), 0)

    kern = functools.partial(
        _flash_attn_kernel, n_heads=n_heads, n_kv_heads=n_kv_heads,
        n_rep=n_rep, head_dim=head_dim, sm_scale=sm_scale,
        block_q=bq, block_kv=bkv)

    return pl.pallas_call(
        kern,
        out_shape=jax.ShapeDtypeStruct((B, S, nq), qkv.dtype),
        grid=(B, S // bq, S // bkv),
        in_specs=[
            pl.BlockSpec((1, bq, nq), lambda b, i, j: (b, i, 0)),    # q columns
            pl.BlockSpec((1, bkv, nkv), k_map),                      # k columns
            pl.BlockSpec((1, bkv, nkv), v_map),                      # v columns
            pl.BlockSpec((bq, head_dim), lambda b, i, j: (i, 0)),    # cos(q pos)
            pl.BlockSpec((bq, head_dim), lambda b, i, j: (i, 0)),    # sin(q pos)
            pl.BlockSpec((bkv, head_dim), ck_map),                   # cos(k pos)
            pl.BlockSpec((bkv, head_dim), ck_map),                   # sin(k pos)
            pl.BlockSpec((A, 2 * nkv), lambda b, i, j: (0, 0)),      # adapter K|V
            pl.BlockSpec(memory_space=pltpu.MemorySpace.SMEM),       # tanh(gate)
        ],
        out_specs=pl.BlockSpec((1, bq, nq), lambda b, i, j: (b, i, 0)),
        scratch_shapes=[
            pltpu.VMEM((n_kv_heads, n_rep * bq, head_dim), qkv.dtype),  # roped q
            pltpu.VMEM((n_kv_heads, n_rep * bq, 1), jnp.float32),       # m
            pltpu.VMEM((n_kv_heads, n_rep * bq, 1), jnp.float32),       # l
            pltpu.VMEM((n_kv_heads, n_rep * bq, head_dim), jnp.float32)],  # acc
        compiler_params=pltpu.CompilerParams(
            dimension_semantics=("parallel", "parallel", "arbitrary"),
            vmem_limit_bytes=_VMEM_LIMIT),
    )(qkv, qkv, qkv, cos, sin, cos, sin, akv, gate_tanh)


# -------------- final RMSNorm + output projection + cross entropy ------------

def _norm_logits_ce_kernel(x_ref, g_ref, w_ref, lbl_ref, nll_ref,
                           xn_sc, m_sc, l_sc, p_sc, *, eps):
    j = pl.program_id(1)

    @pl.when(j == 0)
    def _init():
        x = x_ref[...].astype(jnp.float32)
        r = jax.lax.rsqrt(jnp.mean(x * x, axis=-1, keepdims=True) + eps)
        xn_sc[...] = (x * r).astype(x_ref.dtype) * g_ref[...]   # cached per row tile
        m_sc[...] = jnp.full_like(m_sc, -jnp.inf)
        l_sc[...] = jnp.zeros_like(l_sc)
        p_sc[...] = jnp.zeros_like(p_sc)

    logits = jnp.dot(xn_sc[...], w_ref[...],
                     preferred_element_type=jnp.float32)         # (tm, tv)

    tv = logits.shape[1]
    cols = j * tv + jax.lax.broadcasted_iota(jnp.int32, logits.shape, 1)
    hit = cols == lbl_ref[...]                                   # (tm, tv)
    p_sc[...] += jnp.sum(jnp.where(hit, logits, 0.0), axis=-1, keepdims=True)

    m_prev = m_sc[...]
    m_new = jnp.maximum(m_prev, logits.max(axis=-1, keepdims=True))
    l_sc[...] = l_sc[...] * jnp.exp(m_prev - m_new) + jnp.sum(
        jnp.exp(logits - m_new), axis=-1, keepdims=True)
    m_sc[...] = m_new

    @pl.when(j == pl.num_programs(1) - 1)
    def _done():
        nll_ref[...] = m_sc[...] + jnp.log(l_sc[...]) - p_sc[...]


def pallas_norm_logits_ce(x, g, w_out, labels, eps, *, tm=256, tv=512):
    M, D = x.shape
    _, V = w_out.shape
    tm = _pick_tile(M, tm, 16)
    tv = _pick_tile(V, tv, 128)
    return pl.pallas_call(
        functools.partial(_norm_logits_ce_kernel, eps=eps),
        out_shape=jax.ShapeDtypeStruct((M, 1), jnp.float32),
        grid=(M // tm, V // tv),
        in_specs=[pl.BlockSpec((tm, D), lambda i, j: (i, 0)),
                  pl.BlockSpec((1, D), lambda i, j: (0, 0)),
                  pl.BlockSpec((D, tv), lambda i, j: (0, j)),
                  pl.BlockSpec((tm, 1), lambda i, j: (i, 0))],
        out_specs=pl.BlockSpec((tm, 1), lambda i, j: (i, 0)),
        scratch_shapes=[pltpu.VMEM((tm, D), x.dtype),
                        pltpu.VMEM((tm, 1), jnp.float32),
                        pltpu.VMEM((tm, 1), jnp.float32),
                        pltpu.VMEM((tm, 1), jnp.float32)],
        compiler_params=pltpu.CompilerParams(
            dimension_semantics=("parallel", "arbitrary"),
            vmem_limit_bytes=_VMEM_LIMIT),
    )(x, g.reshape(1, D), w_out, labels.reshape(M, 1).astype(jnp.int32))


# ------------------------------- model glue ----------------------------------

def precompute_rope_tables(dim, end, theta):
    """Half-split RoPE tables; with the q/k weight-column permutation applied
    at init this is exactly equivalent to torch's interleaved rotary form."""
    freqs = 1.0 / theta ** (jnp.arange(0, dim, 2)[: dim // 2]
                            .astype(jnp.float32) / dim)
    t = jnp.arange(end, dtype=jnp.float32)
    f = jnp.outer(t, freqs)
    cos = jnp.cos(f)
    sin = jnp.sin(f)
    return (jnp.concatenate([cos, cos], axis=-1),
            jnp.concatenate([-sin, sin], axis=-1))


def _permute_rope_cols(w, n_heads, head_dim):
    """Reorder interleaved (even, odd) feature pairs of each head into the
    half-split layout.  q.k dot products (and therefore the whole forward
    pass) are unchanged — this is a pure weight-layout transform."""
    d_in = w.shape[0]
    return (w.reshape(d_in, n_heads, head_dim // 2, 2)
              .transpose(0, 1, 3, 2)
              .reshape(d_in, n_heads * head_dim))


def attention_forward(x, w, cos, sin, adapter, cfg):
    B, S, D = x.shape
    H, KVH, Dh = cfg['n_heads'], cfg['n_kv_heads'], cfg['head_dim']
    nq, nkv = H * Dh, KVH * Dh

    # fused attn_norm + QKV projection; the attention kernel consumes the fused
    # activation directly (no split copies, no head-major transposes).
    qkv = pallas_rmsnorm_matmul(x.reshape(B * S, D), w['attn_norm'], w['wqkv'],
                                cfg['norm_eps']).reshape(B, S, nq + 2 * nkv)

    # adapter K/V: shared across the batch (no norm, no rope, no HBM broadcast)
    akv = pallas_matmul(adapter, w['wqkv'][:, nq:])            # (A, 2*KVH*Dh)

    attn = pallas_flash_attention(
        qkv, cos, sin, akv, jnp.tanh(w['gate'].astype(jnp.float32)),
        n_heads=H, n_kv_heads=KVH, head_dim=Dh,
        sm_scale=1.0 / math.sqrt(Dh),
        block_q=cfg.get('attn_block_q', 256),
        block_kv=cfg.get('attn_block_kv', 256))                 # (B, S, H*Dh)

    return pallas_matmul(attn.reshape(B * S, nq), w['wo']).reshape(B, S, D)


def transformer_block(x, w, cos, sin, adapter, cfg):
    B, S, D = x.shape
    h = x + attention_forward(x, w, cos, sin, adapter, cfg)
    hid = pallas_rmsnorm_swiglu(h.reshape(B * S, D), w['ffn_norm'],
                                w['w1'], w['w3'], cfg['norm_eps'])
    ffn = pallas_matmul(hid, w['w2']).reshape(B, S, D)
    return h + ffn


def transformer_forward(params, data, cfg):
    vqa_id = data['vqa_id']          # (bsz, n_options, S) int32
    vqa_label = data['vqa_label']    # (bsz, n_options, S) int32
    bsz, n_options, S = vqa_id.shape
    D = cfg['dim']

    ids = vqa_id.reshape(-1, S)
    labels = vqa_label.reshape(-1, S)[:, 1:].reshape(-1)

    h = jnp.take(params['tok_embeddings'], ids, axis=0)        # (B, S, D) bf16
    cos = params['freqs_cos'][:S]
    sin = params['freqs_sin'][:S]
    adapter = params['adapter_query'].reshape(cfg['adapter_layer'],
                                              cfg['adapter_len'], D)

    # multimodal projection ('clip', linear) + feature insertion
    feats = data['mm_features_clip'].astype(h.dtype)
    feats_proj = pallas_matmul(feats, params['mm_proj_clip'])
    fnorm = jnp.mean(jnp.linalg.norm(feats_proj.astype(jnp.float32), axis=-1))
    mf = cfg['max_feats_clip']
    feats_proj = feats_proj.reshape(bsz, mf, D)
    h = h.reshape(bsz, n_options, S, D)
    st = cfg['mm_start']   # TODO(synk): reference uses per-sample mm_starts; fixed start here
    h = h.at[:, :, st:st + mf, :].set(feats_proj[:, None, :, :])
    h = h.reshape(bsz * n_options, S, D)

    layer_ws = params['layers'][-cfg['adapter_layer']:]
    for i, lw in enumerate(layer_ws):
        h = transformer_block(h, lw, cos, sin, adapter[i], cfg)

    # fused final RMSNorm + output projection + cross-entropy (ignore_index=0)
    hsel = h[:, :-1, :].reshape(bsz * n_options * (S - 1), D)
    nll = pallas_norm_logits_ce(hsel, params['norm'], params['output'],
                                labels, cfg['norm_eps'])[:, 0]
    valid = (labels != 0).astype(jnp.float32)
    loss = jnp.sum(nll * valid) / jnp.maximum(jnp.sum(valid), 1.0)
    return loss, fnorm


# --------------------------- deterministic init ------------------------------

def init_params(key, cfg):
    D, V = cfg['dim'], cfg['vocab_size']
    H, KVH, Dh = cfg['n_heads'], cfg['n_kv_heads'], cfg['head_dim']
    FH = cfg['ffn_hidden']
    dt = jnp.bfloat16
    keys = jax.random.split(key, 256)
    it = iter(keys)

    def w(shape, scale=0.02):
        return (scale * jax.random.normal(next(it), shape,
                                          dtype=jnp.float32)).astype(dt)

    layers = []
    for _ in range(cfg['n_layers']):
        wq = _permute_rope_cols(w((D, H * Dh)), H, Dh)
        wk = _permute_rope_cols(w((D, KVH * Dh)), KVH, Dh)
        wv = w((D, KVH * Dh))
        layers.append(dict(
            wqkv=jnp.concatenate([wq, wk, wv], axis=1),   # fused QKV weight
            wo=w((H * Dh, D)),
            # torch inits gate to zeros; small nonzero values so the adapter
            # branch is actually exercised in this synthetic run.
            gate=w((H,), scale=0.5),
            w1=w((D, FH)), w2=w((FH, D)), w3=w((D, FH)),
            attn_norm=jnp.ones((D,), dt),
            ffn_norm=jnp.ones((D,), dt),
        ))

    cos, sin = precompute_rope_tables(Dh, cfg['max_seq_len'] * 2,
                                      cfg['rope_theta'])
    return dict(
        tok_embeddings=w((V, D)),
        adapter_query=w((cfg['adapter_len'] * cfg['adapter_layer'], D)),
        mm_proj_clip=w((cfg['input_dim_clip'], D)),
        norm=jnp.ones((D,), dt),
        output=w((D, V)),
        layers=layers,
        freqs_cos=cos,
        freqs_sin=sin,
    )


if __name__ == "__main__":
    # small ModelArgs-consistent config: dim=256, n_heads=2 -> head_dim=128,
    # n_kv_heads=1 (exercises GQA), ffn hidden = 768.
    cfg = dict(dim=256, n_layers=2, n_heads=2, n_kv_heads=1, head_dim=128,
               vocab_size=512, norm_eps=1e-5, rope_theta=500000.0,
               max_seq_len=64, adapter_len=8, adapter_layer=2,
               ffn_hidden=768, input_dim_clip=128, max_feats_clip=2,
               mm_start=1)

    key = jax.random.PRNGKey(0)
    kp, kd1, kd2, kd3 = jax.random.split(key, 4)
    params = init_params(kp, cfg)

    bsz, n_options, seqlen = 2, 2, 32
    vqa_id = jax.random.randint(kd1, (bsz, n_options, seqlen), 0,
                                cfg['vocab_size'], dtype=jnp.int32)
    vqa_label = jax.random.randint(kd2, (bsz, n_options, seqlen), 0,
                                   cfg['vocab_size'], dtype=jnp.int32)
    mm_feats = jax.random.normal(
        kd3, (bsz * cfg['max_feats_clip'], cfg['input_dim_clip']),
        dtype=jnp.float32)

    data = dict(vqa_id=vqa_id, vqa_label=vqa_label, mm_features_clip=mm_feats)
    loss, fnorm = transformer_forward(params, data, cfg)
    jax.block_until_ready((loss, fnorm))
    print("KERNEL_OK")
</pallas_src>

<mosaic_0001>
module attributes {stable_mosaic.version = 11 : i64} {
  func.func @_matmul_kernel(%arg0: i32, %arg1: i32, %arg2: i32, %arg3: memref<4x128xbf16, #tpu.memory_space<vmem>>, %arg4: memref<128x256xbf16, #tpu.memory_space<vmem>>, %arg5: memref<4x256xbf16, #tpu.memory_space<vmem>>, %arg6: memref<4x256xf32, #tpu.memory_space<vmem>>) attributes {dimension_semantics = [#tpu.dimension_semantics<parallel>, #tpu.dimension_semantics<parallel>, #tpu.dimension_semantics<arbitrary>], iteration_bounds = array<i64: 1, 1, 1>, scalar_prefetch = 0 : i64, scratch_operands = 1 : i64, tpu.core_type = #tpu.core_type<tc>, window_params = [{transform_indices = @transform_0, window_bounds = array<i64: 4, 128>}, {transform_indices = @transform_1, window_bounds = array<i64: 128, 256>}, {transform_indices = @transform_2, window_bounds = array<i64: 4, 256>}]} {
    %c0_i32 = arith.constant 0 : i32
    %0 = arith.cmpi eq, %arg2, %c0_i32 : i32
    %1 = arith.extui %0 : i1 to i32
    %c0_i32_0 = arith.constant 0 : i32
    %2 = arith.cmpi ne, %1, %c0_i32_0 : i32
    scf.if %2 {
      %cst_10 = arith.constant 0.000000e+00 : f32
      %12 = vector.broadcast %cst_10 : f32 to vector<4x256xf32>
      %c0_11 = arith.constant 0 : index
      %c0_12 = arith.constant 0 : index
      %13 = vector.load %arg6[%c0_11, %c0_12] : memref<4x256xf32, #tpu.memory_space<vmem>>, vector<4x256xf32>
      tpu.vector_store %arg6[%c0_11, %c0_12], %12 {strides = array<i32>} : memref<4x256xf32, #tpu.memory_space<vmem>>, vector<4x256xf32>,
    } else {
    }
    %c0 = arith.constant 0 : index
    %c0_1 = arith.constant 0 : index
    %3 = vector.load %arg6[%c0, %c0_1] : memref<4x256xf32, #tpu.memory_space<vmem>>, vector<4x256xf32>
    %c0_2 = arith.constant 0 : index
    %c0_3 = arith.constant 0 : index
    %4 = vector.load %arg3[%c0_2, %c0_3] : memref<4x128xbf16, #tpu.memory_space<vmem>>, vector<4x128xbf16>
    %c0_4 = arith.constant 0 : index
    %c0_5 = arith.constant 0 : index
    %5 = vector.load %arg4[%c0_4, %c0_5] : memref<128x256xbf16, #tpu.memory_space<vmem>>, vector<128x256xbf16>
    %cst = arith.constant dense<0.000000e+00> : vector<4x256xf32>
    %6 = tpu.matmul %4, %5, %cst {dimension_numbers = #tpu.dot_dimension_numbers<[1], [0], [0], [1], [0, 0, 1, 1], [], []>} : vector<4x128xbf16>, vector<128x256xbf16>, vector<4x256xf32> -> vector<4x256xf32>
    %7 = arith.addf %3, %6 : vector<4x256xf32>
    %c0_6 = arith.constant 0 : index
    %c0_7 = arith.constant 0 : index
    %8 = vector.load %arg6[%c0_6, %c0_7] : memref<4x256xf32, #tpu.memory_space<vmem>>, vector<4x256xf32>
    tpu.vector_store %arg6[%c0_6, %c0_7], %7 {strides = array<i32>} : memref<4x256xf32, #tpu.memory_space<vmem>>, vector<4x256xf32>,
    %c0_i32_8 = arith.constant 0 : i32
    %9 = arith.cmpi eq, %arg2, %c0_i32_8 : i32
    %10 = arith.extui %9 : i1 to i32
    %c0_i32_9 = arith.constant 0 : i32
    %11 = arith.cmpi ne, %10, %c0_i32_9 : i32
    scf.if %11 {
      %c0_10 = arith.constant 0 : index
      %c0_11 = arith.constant 0 : index
      %12 = vector.load %arg6[%c0_10, %c0_11] : memref<4x256xf32, #tpu.memory_space<vmem>>, vector<4x256xf32>
      %13 = arith.truncf %12 : vector<4x256xf32> to vector<4x256xbf16>
      %c0_12 = arith.constant 0 : index
      %c0_13 = arith.constant 0 : index
      %14 = vector.load %arg5[%c0_12, %c0_13] : memref<4x256xbf16, #tpu.memory_space<vmem>>, vector<4x256xbf16>
      tpu.vector_store %arg5[%c0_12, %c0_13], %13 {strides = array<i32>} : memref<4x256xbf16, #tpu.memory_space<vmem>>, vector<4x256xbf16>,
    } else {
    }
    return
  }
  func.func @transform_0(%arg0: i32, %arg1: i32, %arg2: i32) -> (i32, i32) {
    %c0_i32 = arith.constant 0 : i32
    return %arg0, %arg2 : i32, i32
  }
  func.func @transform_1(%arg0: i32, %arg1: i32, %arg2: i32) -> (i32, i32) {
    %c0_i32 = arith.constant 0 : i32
    return %arg2, %arg1 : i32, i32
  }
  func.func @transform_2(%arg0: i32, %arg1: i32, %arg2: i32) -> (i32, i32) {
    %c0_i32 = arith.constant 0 : i32
    return %arg0, %arg1 : i32, i32
  }
}

</mosaic_0001>

<bundles_post_ra>
// kernel: tpu_custom_call.1
= control target key start
LH: loop header
LB: loop body
LE: loop exit
PB: predicated region body
PF: predicated region fallthrough
CT: control target
= control target key end

     0   :  { %7 = vsyncpa [#allocation4], 0  ;;  %s408_s0 = inlined_call_operand.hbm [shape: bf16[4,128], index: 0, kind: input, shape index: {}]   ;;  %s409_s1 = inlined_call_operand.hbm [shape: bf16[128,256], index: 1, kind: input, shape index: {}]   ;;  %s410_s2 = inlined_call_operand.hbm [shape: bf16[4,256], index: 2, kind: output, shape index: {}]  }
   0x1   :  { %8 = vsyncpa [#allocation7], 0 }
   0x2   :  { %9 = vsyncpa [#allocation5], 0  ;;  %s15_s11 = sshll.u32 %s408_s0, 4  ;;  %s379_s12 = smov [#allocation3]   ;;  %s16_s11 = int_to_ptr.hbm [resolvable:$true] %s15_s11 }
   0x3   :  { %s17_s13 = sshll.u32 %s379_s12, 4  ;;  %s25_s16 = sshll.u32 %s409_s1, 4  ;;  %s18_s13 = int_to_ptr.vmem [resolvable:$true] %s17_s13  ;;  %s26_s16 = int_to_ptr.hbm [resolvable:$true] %s25_s16 }
   0x4   :  { %20 = dma.hbm_to_vmem [thread:$0]  %s16_s11, 32, %s18_s13, [#allocation4]  }
   0x5   :  { %s380_s17 = smov [#allocation6]   ;;  %s381_s19 = smov 128  }
   0x6   :  { %s27_s18 = sshll.u32 %s380_s17, 4  ;;  %s382_s20 = smov 8   ;;  %s28_s18 = int_to_ptr.vmem [resolvable:$true] %s27_s18 }
   0x7   :  { %33 = dma.hbm_to_vmem [thread:$0]  %s26_s16, 2048, %s28_s18, [#allocation7], %s381_s19, %s381_s19, %s382_s20  }
   0x8   :  { %373 = dma.done.wait [#allocation4], 32  }
   0x9   :  { %374 = vsyncadd [#allocation4], 4294967264 }
   0xa   :  { %375 = dma.done.wait [#allocation7], 2048  }
   0xb   :  { %376 = vsyncadd [#allocation7], 4294965248  ;;  %v274_v0 = vld [vmem:[#allocation6 + $0x70] sm:$0xf]  ;;  %v295_v1 = vld [vmem:[#allocation6 + $0x74] sm:$0xf0] }
   0xc   :  { %v294_v2 = vld [vmem:[#allocation6 + $0x74] sm:$0xf]  ;;  %v275_v3 = vor.u32 %v295_v1, %v274_v0  ;;  %v276_v4 = vld [vmem:[#allocation6 + $0x78] sm:$0xf0]  ;;  %v266_v5 = vld [vmem:[#allocation6 + $0x60] sm:$0xf] }
   0xd   :  { %v293_v6 = vld [vmem:[#allocation6 + $0x64] sm:$0xf0]  ;;  %v279_v7 = vor.u32 %v294_v2, %v276_v4  ;;  %v292_v8 = vld [vmem:[#allocation6 + $0x64] sm:$0xf]  ;;  %v268_v9 = vld [vmem:[#allocation6 + $0x68] sm:$0xf0] }
   0xe   :  { %145 = vmatpush.bf16.msra.mxu0 %v275_v3  ;;  %v267_v10 = vor.u32 %v293_v6, %v266_v5  ;;  %v271_v11 = vor.u32 %v292_v8, %v268_v9  ;;  %v258_v12 = vld [vmem:[#allocation6 + $0x50] sm:$0xf]  ;;  %v291_v13 = vld [vmem:[#allocation6 + $0x54] sm:$0xf0]  ;;  %v290_v14 = vld [vmem:[#allocation6 + $0x54] sm:$0xf] }
   0xf   :  { %158 = vmatpush.bf16.msra.mxu1 %v279_v7  ;;  %v260_v15 = vld [vmem:[#allocation6 + $0x58] sm:$0xf0]  ;;  %v259_v16 = vor.u32 %v291_v13, %v258_v12  ;;  %v250_v18 = vld [vmem:[#allocation6 + $0x40] sm:$0xf]  ;;  %v289_v19 = vld [vmem:[#allocation6 + $0x44] sm:$0xf0] }
  0x10   :  { %v263_v17 = vor.u32 %v290_v14, %v260_v15  ;;  %v288_v20 = vld [vmem:[#allocation6 + $0x44] sm:$0xf]  ;;  %v252_v21 = vld [vmem:[#allocation6 + $0x48] sm:$0xf0]  ;;  %v251_v22 = vor.u32 %v289_v19, %v250_v18  ;;  %v242_v24 = vld [vmem:[#allocation6 + $0x30] sm:$0xf] }
  0x11   :  { %v255_v23 = vor.u32 %v288_v20, %v252_v21  ;;  %v287_v25 = vld [vmem:[#allocation6 + $0x34] sm:$0xf0]  ;;  %v286_v26 = vld [vmem:[#allocation6 + $0x34] sm:$0xf]  ;;  %v244_v27 = vld [vmem:[#allocation6 + $0x38] sm:$0xf0] }
  0x12   :  { %146 = vmatpush.bf16.msra.mxu0 %v267_v10  ;;  %v243_v28 = vor.u32 %v287_v25, %v242_v24  ;;  %v247_v29 = vor.u32 %v286_v26, %v244_v27  ;;  %v234_v30 = vld [vmem:[#allocation6 + $0x20] sm:$0xf]  ;;  %v285_v31 = vld [vmem:[#allocation6 + $0x24] sm:$0xf0]  ;;  %v284_v32 = vld [vmem:[#allocation6 + $0x24] sm:$0xf] }
  0x13   :  { %159 = vmatpush.bf16.msra.mxu1 %v271_v11  ;;  %v236_v33 = vld [vmem:[#allocation6 + $0x28] sm:$0xf0]  ;;  %v235_v34 = vor.u32 %v285_v31, %v234_v30  ;;  %v226_v36 = vld [vmem:[#allocation6 + $0x10] sm:$0xf]  ;;  %v283_v37 = vld [vmem:[#allocation6 + $0x14] sm:$0xf0] }
  0x14   :  { %v239_v35 = vor.u32 %v284_v32, %v236_v33  ;;  %v282_v38 = vld [vmem:[#allocation6 + $0x14] sm:$0xf]  ;;  %v228_v39 = vld [vmem:[#allocation6 + $0x18] sm:$0xf0]  ;;  %v227_v40 = vor.u32 %v283_v37, %v226_v36  ;;  %v218_v42 = vld [vmem:[#allocation6] sm:$0xf] }
  0x15   :  { %v231_v41 = vor.u32 %v282_v38, %v228_v39  ;;  %v281_v43 = vld [vmem:[#allocation6 + $0x4] sm:$0xf0]  ;;  %v280_v44 = vld [vmem:[#allocation6 + $0x4] sm:$0xf]  ;;  %v220_v45 = vld [vmem:[#allocation6 + $0x8] sm:$0xf0] }
  0x16   :  { %147 = vmatpush.bf16.msra.mxu0 %v259_v16  ;;  %v219_v46 = vor.u32 %v281_v43, %v218_v42  ;;  %v223_v47 = vor.u32 %v280_v44, %v220_v45  ;;  %v48_v48 = vld [vmem:[#allocation3] sm:$0x3]  ;;  %vm174_vm0 = vcmask 1043456   ;;  %s383_s0 = smov [#allocation8]   ;;  %s205_s23 = sshll.u32 %s410_s2, 4  ;;  %vm192_vm1 = vcmask 1041408   ;;  %s206_s23 = int_to_ptr.hbm [resolvable:$true] %s205_s23 }
  0x17   :  { %160 = vmatpush.bf16.msra.mxu1 %v263_v17  ;;  %s203_s1 = sshll.u32 %s383_s0, 4  ;;  %s204_s1 = int_to_ptr.vmem [resolvable:$true] %s203_s1 }
  0x1a   :  { %148 = vmatpush.bf16.msra.mxu0 %v251_v22 }
  0x1b   :  { %161 = vmatpush.bf16.msra.mxu1 %v255_v23 }
  0x1e   :  { %149 = vmatpush.bf16.msra.mxu0 %v243_v28 }
  0x1f   :  { %162 = vmatpush.bf16.msra.mxu1 %v247_v29 }
  0x22   :  { %150 = vmatpush.bf16.msra.mxu0 %v235_v34 }
  0x23   :  { %163 = vmatpush.bf16.msra.mxu1 %v239_v35 }
  0x26   :  { %151 = vmatpush.bf16.msra.mxu0 %v227_v40 }
  0x27   :  { %164 = vmatpush.bf16.msra.mxu1 %v231_v41 }
  0x2a   :  { %152 = vmatpush.bf16.msra.mxu0 %v219_v46 }
  0x2b   :  { %165 = vmatpush.bf16.msra.mxu1 %v223_v47 }
  0x2d   :  { %153 = vmatmul.bf16.vlgmr.msra.gmra.mxu0 %v48_v48 }
  0x2e   :  { %166 = vmatmul.bf16.vlgmr.msra.gmra.mxu1 %v48_v48 }
  0xaa   :  { %v154_v49 = vpop.f32.mrf.mxu0 }
  0xab   :  { %v167_v50 = vpop.f32.mrf.mxu1 }
  0xac   :  { %v173_v51 = vrot.slane %v167_v50, 4 }
  0xae   :  { %v175_v52 = vsel %vm174_vm0, %v154_v49, %v173_v51 }
  0xaf   :  { %184 = vst [vmem:[#allocation1] ss:$2 sm:$0xff] %v175_v52 }
  0xb2   :  { %v156_v53 = vpop.f32.mrf.mxu0 }
  0xb3   :  { %v169_v54 = vpop.f32.mrf.mxu1 }
  0xb6   :  { %v185_v55 = vld.sshfl [vmem:[#allocation1] sm:$0xff pattern:$0x75316420]  ;;  %v186_v56 = vld.sshfl [vmem:[#allocation1 + $0x8] sm:$0xff pattern:$0x75316420] }
  0xb7   :  { %v189_v57 = vpack.c.bf16 %v186_v56, %v185_v55 }
  0xb9   :  { %v191_v58 = vrot.slane %v189_v57, 2 }
  0xbb   :  { %v195_v59 = vsel %vm192_vm1, %v189_v57, %v191_v58 }
  0xbc   :  { %197 = vst [vmem:[#allocation8] sm:$0xf] %v195_v59 }
  0xbd   :  { %208 = dma.vmem_to_hbm [thread:$0]  %s204_s1, 64, %s206_s23, [#allocation5]  }
  0xbe   :  { %377 = dma.done.wait [#allocation5], 64  }
  0xbf   :  { %378 = vsyncadd [#allocation5], 4294967232 }
  0xc0   :  { %213 = vsyncpa [#allocation4], 1 }
  0xc1   :  { %214 = vsyncpa [#allocation7], 1 }
  0xc2   :  { %215 = vsyncpa [#allocation5], 1 }

</bundles_post_ra>
